<compile_context>
chip_gen: v5e
topology: v5e:2x2
jax: 0.10.0
libtpu: 0.0.40
codegen_flags: <defaults>
</compile_context>

<pallas_src>
import functools
import math

import jax
import jax.numpy as jnp
from jax.experimental import pallas as pl
from jax.experimental.pallas import tpu as pltpu

LANES = 128
TARGET_BLOCK_BYTES = 2 * 1024 * 1024   # ~2 MiB per input block per grid step
STRIP = 512                            # rows per inner fori_loop strip
NCORES = 2                             # v7x has 2 TensorCores; harmless on 1-TC chips


def _min_rows(dtype):
    # Sublane-tile height: f32 -> 8, bf16/f16 -> 16, int8/fp8 -> 32.
    itemsize = jnp.dtype(dtype).itemsize
    return 8 * max(1, 4 // itemsize)


def _choose_tiles(rows, dtype):
    itemsize = jnp.dtype(dtype).itemsize
    min_tm = _min_rows(dtype)
    max_tm = max(min_tm, TARGET_BLOCK_BYTES // (LANES * itemsize))
    if rows >= STRIP:
        tm = min(max_tm, (rows // STRIP) * STRIP)
        strip = STRIP
    else:
        tm = (rows // min_tm) * min_tm
        strip = tm
    return tm, strip


def _accumulate_block(x_ref, y_ref, acc_ref, *, tm, strip, masked,
                      rows=None, row0=None):
    """Adds this block's (8,128) per-lane partial sums into acc_ref (6,8,128)."""
    n_strips = tm // strip
    zero = jnp.zeros((8, LANES), jnp.float32)

    def body(s, carry):
        start = pl.multiple_of(s * strip, strip)
        x = x_ref[pl.ds(start, strip), :].astype(jnp.float32)
        y = y_ref[pl.ds(start, strip), :].astype(jnp.float32)
        if masked:
            # Only executed on the ragged / fully-out-of-range block(s).
            rid = row0 + start + jax.lax.broadcasted_iota(
                jnp.int32, (strip, LANES), 0)
            valid = rid < rows
            x = jnp.where(valid, x, 0.0)
            y = jnp.where(valid, y, 0.0)
        d = x - y

        def part(v):   # (strip,128) -> (8,128): vreg-wise VALU adds only
            return v.reshape(strip // 8, 8, LANES).sum(axis=0)

        c0, c1, c2, c3, c4, c5 = carry
        return (c0 + part(x * y), c1 + part(x), c2 + part(y),
                c3 + part(x * x), c4 + part(y * y), c5 + part(d * d))

    parts = jax.lax.fori_loop(0, n_strips, body, (zero,) * 6,
                              unroll=n_strips if n_strips <= 2 else 2)
    for k in range(6):
        acc_ref[k] += parts[k]


def _sums_kernel(x_ref, y_ref, out_ref, acc_ref, *,
                 rows, tm, strip, inner_len, n_full, needs_mask):
    c = pl.program_id(0)          # "core" (parallel) axis
    i = pl.program_id(1)          # reduction (arbitrary) axis

    @pl.when(i == 0)
    def _init():
        acc_ref[...] = jnp.zeros_like(acc_ref)

    block = c * inner_len + i     # logical row-block index

    if needs_mask:
        @pl.when(block < n_full)
        def _fast():
            _accumulate_block(x_ref, y_ref, acc_ref, tm=tm, strip=strip,
                              masked=False)

        @pl.when(block >= n_full)
        def _ragged():
            _accumulate_block(x_ref, y_ref, acc_ref, tm=tm, strip=strip,
                              masked=True, rows=rows, row0=block * tm)
    else:
        _accumulate_block(x_ref, y_ref, acc_ref, tm=tm, strip=strip,
                          masked=False)

    @pl.when(i == pl.num_programs(1) - 1)
    def _finalize():
        # Dump the six (8,128) per-lane partials into this core's output block.
        # Cross-sublane / cross-lane / cross-core reductions happen in the
        # JAX wrapper (also better summation accuracy for huge inputs).
        for k in range(6):
            out_ref[k * 8:(k + 1) * 8, :] = acc_ref[k]


def _compute_sums(x2d, y2d):
    rows = x2d.shape[0]
    tm, strip = _choose_tiles(rows, x2d.dtype)
    g_total = pl.cdiv(rows, tm)                     # total row-blocks
    ncores = NCORES if g_total >= NCORES else 1
    inner_len = pl.cdiv(g_total, ncores)
    n_full = rows // tm                             # blocks with no ragged rows
    needs_mask = (ncores * inner_len) > n_full

    def in_map(c, i):
        # Clamp so padded (fully out-of-range) blocks re-read the last valid
        # block; their contribution is masked to zero in-kernel.
        return (jnp.minimum(c * inner_len + i, g_total - 1), 0)

    kernel = functools.partial(
        _sums_kernel, rows=rows, tm=tm, strip=strip,
        inner_len=inner_len, n_full=n_full, needs_mask=needs_mask)

    partials = pl.pallas_call(
        kernel,
        out_shape=jax.ShapeDtypeStruct((ncores, 48, LANES), jnp.float32),
        grid_spec=pltpu.PrefetchScalarGridSpec(
            num_scalar_prefetch=0,
            grid=(ncores, inner_len),
            in_specs=[
                pl.BlockSpec((tm, LANES), in_map),
                pl.BlockSpec((tm, LANES), in_map),
            ],
            out_specs=pl.BlockSpec((None, 48, LANES), lambda c, i: (c, 0, 0)),
            scratch_shapes=[pltpu.VMEM((6, 8, LANES), jnp.float32)],
        ),
        compiler_params=pltpu.CompilerParams(
            dimension_semantics=("parallel", "arbitrary"),
            vmem_limit_bytes=32 * 1024 * 1024,
        ),
    )(x2d, y2d)
    # (ncores, 6, 8, 128) -> (6,): final cross-core/sublane/lane reduce in XLA.
    return partials.reshape(ncores, 6, 8, LANES).sum(axis=(0, 2, 3))


def _partial_sums_jax(x, y):
    """Plain-JAX partial sums for the <128-element tail / tiny inputs."""
    x = x.astype(jnp.float32)
    y = y.astype(jnp.float32)
    d = x - y
    return jnp.stack([
        jnp.sum(x * y), jnp.sum(x), jnp.sum(y),
        jnp.sum(x * x), jnp.sum(y * y), jnp.sum(d * d),
    ])


def my_loss(inp, tgt, alph):
    """Pallas equivalent of MyLoss(alph).forward(inp, tgt)."""
    assert inp.shape == tgt.shape
    n = inp.shape[0]                 # matches PyTorch: input.size()[0]
    count = math.prod(inp.shape)     # numel, for mse_loss 'mean'

    x = inp.reshape(-1)              # keep original dtype; upcast in-kernel
    y = tgt.reshape(-1)
    total = x.shape[0]
    rows = total // LANES
    use_kernel = rows >= _min_rows(x.dtype)
    main = rows * LANES if use_kernel else 0

    sums = jnp.zeros((6,), jnp.float32)
    if use_kernel:
        sums = sums + _compute_sums(
            x[:main].reshape(rows, LANES), y[:main].reshape(rows, LANES))
    if main < total:
        sums = sums + _partial_sums_jax(x[main:], y[main:])

    sum_xy, sum_x, sum_y, sum_x2, sum_y2, sum_d2 = (sums[k] for k in range(6))

    # Scalar glue (exact pcc formula from the PyTorch module; n is dim 0).
    nf = jnp.float32(n)
    pcc = (nf * sum_xy - sum_x * sum_y) / jnp.sqrt(
        (nf * sum_x2 - sum_x * sum_x) * (nf * sum_y2 - sum_y * sum_y))
    mse = sum_d2 / jnp.float32(count)
    alph = jnp.float32(alph)
    return alph * (1.0 - jnp.abs(pcc)) + (1.0 - alph) * mse


def _my_loss_ref(inp, tgt, alph):
    """Pure-JAX reference mirroring the PyTorch forward."""
    x = inp.astype(jnp.float32)
    y = tgt.astype(jnp.float32)
    sum_xy = jnp.sum(x * y)
    sum_x = jnp.sum(x)
    sum_y = jnp.sum(y)
    sum_x2 = jnp.sum(x * x)
    sum_y2 = jnp.sum(y * y)
    n = jnp.float32(inp.shape[0])
    pcc = (n * sum_xy - sum_x * sum_y) / jnp.sqrt(
        (n * sum_x2 - sum_x * sum_x) * (n * sum_y2 - sum_y * sum_y))
    mse = jnp.mean((x - y) ** 2)
    return alph * (1.0 - jnp.abs(pcc)) + (1.0 - alph) * mse


if __name__ == "__main__":
    key = jax.random.PRNGKey(0)
    alph = 0.7

    cases = [
        (2, 4, 16, 16),     # small NCHW-style demo input (single block)
        (3, 4, 40, 37),     # ragged rows + <128-element JAX tail + 2-block grid
        (8, 25, 32, 32),    # multi-strip blocks + ragged block on the 2nd "core"
    ]
    for idx, shape in enumerate(cases):
        k1, k2 = jax.random.split(jax.random.fold_in(key, idx))
        inp = jax.random.normal(k1, shape, dtype=jnp.float32)
        tgt = jax.random.normal(k2, shape, dtype=jnp.float32)

        loss = jax.block_until_ready(my_loss(inp, tgt, alph))
        ref = jax.block_until_ready(_my_loss_ref(inp, tgt, alph))
        tol = 2e-3 * max(1.0, float(jnp.abs(ref)))
        assert float(jnp.abs(loss - ref)) <= tol, (shape, float(loss), float(ref))

    print("KERNEL_OK")
</pallas_src>

<mosaic_0001>
module attributes {stable_mosaic.version = 11 : i64} {
  func.func @_sums_kernel(%arg0: i32, %arg1: i32, %arg2: memref<16x128xf32, #tpu.memory_space<vmem>>, %arg3: memref<16x128xf32, #tpu.memory_space<vmem>>, %arg4: memref<1x48x128xf32, #tpu.memory_space<vmem>>, %arg5: memref<6x8x128xf32, #tpu.memory_space<vmem>>) attributes {dimension_semantics = [#tpu.dimension_semantics<parallel>, #tpu.dimension_semantics<arbitrary>], iteration_bounds = array<i64: 1, 1>, scalar_prefetch = 0 : i64, scratch_operands = 1 : i64, tpu.core_type = #tpu.core_type<tc>, window_params = [{transform_indices = @transform_0, window_bounds = array<i64: 16, 128>}, {transform_indices = @transform_1, window_bounds = array<i64: 16, 128>}, {transform_indices = @transform_2, window_bounds = array<i64: 1, 48, 128>}]} {
    %c0_i32 = arith.constant 0 : i32
    %0 = arith.cmpi eq, %arg1, %c0_i32 : i32
    %1 = arith.extui %0 : i1 to i32
    %c0_i32_0 = arith.constant 0 : i32
    %2 = arith.cmpi ne, %1, %c0_i32_0 : i32
    scf.if %2 {
      %cst_42 = arith.constant 0.000000e+00 : f32
      %72 = vector.broadcast %cst_42 : f32 to vector<6x8x128xf32>
      %c0_43 = arith.constant 0 : index
      %c0_44 = arith.constant 0 : index
      %c0_45 = arith.constant 0 : index
      %73 = vector.load %arg5[%c0_43, %c0_44, %c0_45] : memref<6x8x128xf32, #tpu.memory_space<vmem>>, vector<6x8x128xf32>
      tpu.vector_store %arg5[%c0_43, %c0_44, %c0_45], %72 {strides = array<i32>} : memref<6x8x128xf32, #tpu.memory_space<vmem>>, vector<6x8x128xf32>,
    } else {
    }
    %cst = arith.constant 0.000000e+00 : f32
    %3 = vector.broadcast %cst : f32 to vector<8x128xf32>
    %c0_i32_1 = arith.constant 0 : i32
    %c16_i32 = arith.constant 16 : i32
    %4 = arith.muli %c0_i32_1, %c16_i32 : i32
    %5 = tpu.assume_multiple %4, 16 : i32
    %6 = arith.index_cast %5 : i32 to index
    %c0 = arith.constant 0 : index
    %7 = vector.load %arg2[%6, %c0] : memref<16x128xf32, #tpu.memory_space<vmem>>, vector<16x128xf32>
    %8 = arith.index_cast %5 : i32 to index
    %c0_2 = arith.constant 0 : index
    %9 = vector.load %arg3[%8, %c0_2] : memref<16x128xf32, #tpu.memory_space<vmem>>, vector<16x128xf32>
    %10 = arith.subf %7, %9 : vector<16x128xf32>
    %11 = arith.mulf %7, %9 : vector<16x128xf32>
    %12 = vector.shape_cast %11 : vector<16x128xf32> to vector<2x8x128xf32>
    %cst_3 = arith.constant dense<0.000000e+00> : vector<8x128xf32>
    %13 = vector.multi_reduction <add>, %12, %cst_3 [0] : vector<2x8x128xf32> to vector<8x128xf32>
    %14 = arith.addf %3, %13 : vector<8x128xf32>
    %15 = vector.shape_cast %7 : vector<16x128xf32> to vector<2x8x128xf32>
    %cst_4 = arith.constant dense<0.000000e+00> : vector<8x128xf32>
    %16 = vector.multi_reduction <add>, %15, %cst_4 [0] : vector<2x8x128xf32> to vector<8x128xf32>
    %17 = arith.addf %3, %16 : vector<8x128xf32>
    %18 = vector.shape_cast %9 : vector<16x128xf32> to vector<2x8x128xf32>
    %cst_5 = arith.constant dense<0.000000e+00> : vector<8x128xf32>
    %19 = vector.multi_reduction <add>, %18, %cst_5 [0] : vector<2x8x128xf32> to vector<8x128xf32>
    %20 = arith.addf %3, %19 : vector<8x128xf32>
    %21 = arith.mulf %7, %7 : vector<16x128xf32>
    %22 = vector.shape_cast %21 : vector<16x128xf32> to vector<2x8x128xf32>
    %cst_6 = arith.constant dense<0.000000e+00> : vector<8x128xf32>
    %23 = vector.multi_reduction <add>, %22, %cst_6 [0] : vector<2x8x128xf32> to vector<8x128xf32>
    %24 = arith.addf %3, %23 : vector<8x128xf32>
    %25 = arith.mulf %9, %9 : vector<16x128xf32>
    %26 = vector.shape_cast %25 : vector<16x128xf32> to vector<2x8x128xf32>
    %cst_7 = arith.constant dense<0.000000e+00> : vector<8x128xf32>
    %27 = vector.multi_reduction <add>, %26, %cst_7 [0] : vector<2x8x128xf32> to vector<8x128xf32>
    %28 = arith.addf %3, %27 : vector<8x128xf32>
    %29 = arith.mulf %10, %10 : vector<16x128xf32>
    %30 = vector.shape_cast %29 : vector<16x128xf32> to vector<2x8x128xf32>
    %cst_8 = arith.constant dense<0.000000e+00> : vector<8x128xf32>
    %31 = vector.multi_reduction <add>, %30, %cst_8 [0] : vector<2x8x128xf32> to vector<8x128xf32>
    %32 = arith.addf %3, %31 : vector<8x128xf32>
    %c1_i32 = arith.constant 1 : i32
    %c0_9 = arith.constant 0 : index
    %c0_10 = arith.constant 0 : index
    %c0_11 = arith.constant 0 : index
    %33 = vector.load %arg5[%c0_9, %c0_10, %c0_11] : memref<6x8x128xf32, #tpu.memory_space<vmem>>, vector<1x8x128xf32>
    %34 = vector.shape_cast %33 : vector<1x8x128xf32> to vector<8x128xf32>
    %35 = arith.addf %34, %14 : vector<8x128xf32>
    %c0_12 = arith.constant 0 : index
    %c0_13 = arith.constant 0 : index
    %c0_14 = arith.constant 0 : index
    %36 = vector.load %arg5[%c0_12, %c0_13, %c0_14] : memref<6x8x128xf32, #tpu.memory_space<vmem>>, vector<1x8x128xf32>
    %37 = vector.shape_cast %36 : vector<1x8x128xf32> to vector<8x128xf32>
    %38 = vector.shape_cast %35 : vector<8x128xf32> to vector<1x8x128xf32>
    tpu.vector_store %arg5[%c0_12, %c0_13, %c0_14], %38 {strides = array<i32>} : memref<6x8x128xf32, #tpu.memory_space<vmem>>, vector<1x8x128xf32>,
    %c1 = arith.constant 1 : index
    %c0_15 = arith.constant 0 : index
    %c0_16 = arith.constant 0 : index
    %39 = vector.load %arg5[%c1, %c0_15, %c0_16] : memref<6x8x128xf32, #tpu.memory_space<vmem>>, vector<1x8x128xf32>
    %40 = vector.shape_cast %39 : vector<1x8x128xf32> to vector<8x128xf32>
    %41 = arith.addf %40, %17 : vector<8x128xf32>
    %c1_17 = arith.constant 1 : index
    %c0_18 = arith.constant 0 : index
    %c0_19 = arith.constant 0 : index
    %42 = vector.load %arg5[%c1_17, %c0_18, %c0_19] : memref<6x8x128xf32, #tpu.memory_space<vmem>>, vector<1x8x128xf32>
    %43 = vector.shape_cast %42 : vector<1x8x128xf32> to vector<8x128xf32>
    %44 = vector.shape_cast %41 : vector<8x128xf32> to vector<1x8x128xf32>
    tpu.vector_store %arg5[%c1_17, %c0_18, %c0_19], %44 {strides = array<i32>} : memref<6x8x128xf32, #tpu.memory_space<vmem>>, vector<1x8x128xf32>,
    %c2 = arith.constant 2 : index
    %c0_20 = arith.constant 0 : index
    %c0_21 = arith.constant 0 : index
    %45 = vector.load %arg5[%c2, %c0_20, %c0_21] : memref<6x8x128xf32, #tpu.memory_space<vmem>>, vector<1x8x128xf32>
    %46 = vector.shape_cast %45 : vector<1x8x128xf32> to vector<8x128xf32>
    %47 = arith.addf %46, %20 : vector<8x128xf32>
    %c2_22 = arith.constant 2 : index
    %c0_23 = arith.constant 0 : index
    %c0_24 = arith.constant 0 : index
    %48 = vector.load %arg5[%c2_22, %c0_23, %c0_24] : memref<6x8x128xf32, #tpu.memory_space<vmem>>, vector<1x8x128xf32>
    %49 = vector.shape_cast %48 : vector<1x8x128xf32> to vector<8x128xf32>
    %50 = vector.shape_cast %47 : vector<8x128xf32> to vector<1x8x128xf32>
    tpu.vector_store %arg5[%c2_22, %c0_23, %c0_24], %50 {strides = array<i32>} : memref<6x8x128xf32, #tpu.memory_space<vmem>>, vector<1x8x128xf32>,
    %c3 = arith.constant 3 : index
    %c0_25 = arith.constant 0 : index
    %c0_26 = arith.constant 0 : index
    %51 = vector.load %arg5[%c3, %c0_25, %c0_26] : memref<6x8x128xf32, #tpu.memory_space<vmem>>, vector<1x8x128xf32>
    %52 = vector.shape_cast %51 : vector<1x8x128xf32> to vector<8x128xf32>
    %53 = arith.addf %52, %24 : vector<8x128xf32>
    %c3_27 = arith.constant 3 : index
    %c0_28 = arith.constant 0 : index
    %c0_29 = arith.constant 0 : index
    %54 = vector.load %arg5[%c3_27, %c0_28, %c0_29] : memref<6x8x128xf32, #tpu.memory_space<vmem>>, vector<1x8x128xf32>
    %55 = vector.shape_cast %54 : vector<1x8x128xf32> to vector<8x128xf32>
    %56 = vector.shape_cast %53 : vector<8x128xf32> to vector<1x8x128xf32>
    tpu.vector_store %arg5[%c3_27, %c0_28, %c0_29], %56 {strides = array<i32>} : memref<6x8x128xf32, #tpu.memory_space<vmem>>, vector<1x8x128xf32>,
    %c4 = arith.constant 4 : index
    %c0_30 = arith.constant 0 : index
    %c0_31 = arith.constant 0 : index
    %57 = vector.load %arg5[%c4, %c0_30, %c0_31] : memref<6x8x128xf32, #tpu.memory_space<vmem>>, vector<1x8x128xf32>
    %58 = vector.shape_cast %57 : vector<1x8x128xf32> to vector<8x128xf32>
    %59 = arith.addf %58, %28 : vector<8x128xf32>
    %c4_32 = arith.constant 4 : index
    %c0_33 = arith.constant 0 : index
    %c0_34 = arith.constant 0 : index
    %60 = vector.load %arg5[%c4_32, %c0_33, %c0_34] : memref<6x8x128xf32, #tpu.memory_space<vmem>>, vector<1x8x128xf32>
    %61 = vector.shape_cast %60 : vector<1x8x128xf32> to vector<8x128xf32>
    %62 = vector.shape_cast %59 : vector<8x128xf32> to vector<1x8x128xf32>
    tpu.vector_store %arg5[%c4_32, %c0_33, %c0_34], %62 {strides = array<i32>} : memref<6x8x128xf32, #tpu.memory_space<vmem>>, vector<1x8x128xf32>,
    %c5 = arith.constant 5 : index
    %c0_35 = arith.constant 0 : index
    %c0_36 = arith.constant 0 : index
    %63 = vector.load %arg5[%c5, %c0_35, %c0_36] : memref<6x8x128xf32, #tpu.memory_space<vmem>>, vector<1x8x128xf32>
    %64 = vector.shape_cast %63 : vector<1x8x128xf32> to vector<8x128xf32>
    %65 = arith.addf %64, %32 : vector<8x128xf32>
    %c5_37 = arith.constant 5 : index
    %c0_38 = arith.constant 0 : index
    %c0_39 = arith.constant 0 : index
    %66 = vector.load %arg5[%c5_37, %c0_38, %c0_39] : memref<6x8x128xf32, #tpu.memory_space<vmem>>, vector<1x8x128xf32>
    %67 = vector.shape_cast %66 : vector<1x8x128xf32> to vector<8x128xf32>
    %68 = vector.shape_cast %65 : vector<8x128xf32> to vector<1x8x128xf32>
    tpu.vector_store %arg5[%c5_37, %c0_38, %c0_39], %68 {strides = array<i32>} : memref<6x8x128xf32, #tpu.memory_space<vmem>>, vector<1x8x128xf32>,
    %c0_i32_40 = arith.constant 0 : i32
    %69 = arith.cmpi eq, %arg1, %c0_i32_40 : i32
    %70 = arith.extui %69 : i1 to i32
    %c0_i32_41 = arith.constant 0 : i32
    %71 = arith.cmpi ne, %70, %c0_i32_41 : i32
    scf.if %71 {
      %c0_42 = arith.constant 0 : index
      %c0_43 = arith.constant 0 : index
      %c0_44 = arith.constant 0 : index
      %72 = vector.load %arg5[%c0_42, %c0_43, %c0_44] : memref<6x8x128xf32, #tpu.memory_space<vmem>>, vector<1x8x128xf32>
      %73 = vector.shape_cast %72 : vector<1x8x128xf32> to vector<8x128xf32>
      %c0_45 = arith.constant 0 : index
      %c0_46 = arith.constant 0 : index
      %c0_47 = arith.constant 0 : index
      %74 = vector.load %arg4[%c0_45, %c0_46, %c0_47] : memref<1x48x128xf32, #tpu.memory_space<vmem>>, vector<1x8x128xf32>
      %75 = vector.shape_cast %74 : vector<1x8x128xf32> to vector<8x128xf32>
      %76 = vector.shape_cast %73 : vector<8x128xf32> to vector<1x8x128xf32>
      tpu.vector_store %arg4[%c0_45, %c0_46, %c0_47], %76 {strides = array<i32>} : memref<1x48x128xf32, #tpu.memory_space<vmem>>, vector<1x8x128xf32>,
      %c1_48 = arith.constant 1 : index
      %c0_49 = arith.constant 0 : index
      %c0_50 = arith.constant 0 : index
      %77 = vector.load %arg5[%c1_48, %c0_49, %c0_50] : memref<6x8x128xf32, #tpu.memory_space<vmem>>, vector<1x8x128xf32>
      %78 = vector.shape_cast %77 : vector<1x8x128xf32> to vector<8x128xf32>
      %c0_51 = arith.constant 0 : index
      %c8 = arith.constant 8 : index
      %c0_52 = arith.constant 0 : index
      %79 = vector.load %arg4[%c0_51, %c8, %c0_52] : memref<1x48x128xf32, #tpu.memory_space<vmem>>, vector<1x8x128xf32>
      %80 = vector.shape_cast %79 : vector<1x8x128xf32> to vector<8x128xf32>
      %81 = vector.shape_cast %78 : vector<8x128xf32> to vector<1x8x128xf32>
      tpu.vector_store %arg4[%c0_51, %c8, %c0_52], %81 {strides = array<i32>} : memref<1x48x128xf32, #tpu.memory_space<vmem>>, vector<1x8x128xf32>,
      %c2_53 = arith.constant 2 : index
      %c0_54 = arith.constant 0 : index
      %c0_55 = arith.constant 0 : index
      %82 = vector.load %arg5[%c2_53, %c0_54, %c0_55] : memref<6x8x128xf32, #tpu.memory_space<vmem>>, vector<1x8x128xf32>
      %83 = vector.shape_cast %82 : vector<1x8x128xf32> to vector<8x128xf32>
      %c0_56 = arith.constant 0 : index
      %c16 = arith.constant 16 : index
      %c0_57 = arith.constant 0 : index
      %84 = vector.load %arg4[%c0_56, %c16, %c0_57] : memref<1x48x128xf32, #tpu.memory_space<vmem>>, vector<1x8x128xf32>
      %85 = vector.shape_cast %84 : vector<1x8x128xf32> to vector<8x128xf32>
      %86 = vector.shape_cast %83 : vector<8x128xf32> to vector<1x8x128xf32>
      tpu.vector_store %arg4[%c0_56, %c16, %c0_57], %86 {strides = array<i32>} : memref<1x48x128xf32, #tpu.memory_space<vmem>>, vector<1x8x128xf32>,
      %c3_58 = arith.constant 3 : index
      %c0_59 = arith.constant 0 : index
      %c0_60 = arith.constant 0 : index
      %87 = vector.load %arg5[%c3_58, %c0_59, %c0_60] : memref<6x8x128xf32, #tpu.memory_space<vmem>>, vector<1x8x128xf32>
      %88 = vector.shape_cast %87 : vector<1x8x128xf32> to vector<8x128xf32>
      %c0_61 = arith.constant 0 : index
      %c24 = arith.constant 24 : index
      %c0_62 = arith.constant 0 : index
      %89 = vector.load %arg4[%c0_61, %c24, %c0_62] : memref<1x48x128xf32, #tpu.memory_space<vmem>>, vector<1x8x128xf32>
      %90 = vector.shape_cast %89 : vector<1x8x128xf32> to vector<8x128xf32>
      %91 = vector.shape_cast %88 : vector<8x128xf32> to vector<1x8x128xf32>
      tpu.vector_store %arg4[%c0_61, %c24, %c0_62], %91 {strides = array<i32>} : memref<1x48x128xf32, #tpu.memory_space<vmem>>, vector<1x8x128xf32>,
      %c4_63 = arith.constant 4 : index
      %c0_64 = arith.constant 0 : index
      %c0_65 = arith.constant 0 : index
      %92 = vector.load %arg5[%c4_63, %c0_64, %c0_65] : memref<6x8x128xf32, #tpu.memory_space<vmem>>, vector<1x8x128xf32>
      %93 = vector.shape_cast %92 : vector<1x8x128xf32> to vector<8x128xf32>
      %c0_66 = arith.constant 0 : index
      %c32 = arith.constant 32 : index
      %c0_67 = arith.constant 0 : index
      %94 = vector.load %arg4[%c0_66, %c32, %c0_67] : memref<1x48x128xf32, #tpu.memory_space<vmem>>, vector<1x8x128xf32>
      %95 = vector.shape_cast %94 : vector<1x8x128xf32> to vector<8x128xf32>
      %96 = vector.shape_cast %93 : vector<8x128xf32> to vector<1x8x128xf32>
      tpu.vector_store %arg4[%c0_66, %c32, %c0_67], %96 {strides = array<i32>} : memref<1x48x128xf32, #tpu.memory_space<vmem>>, vector<1x8x128xf32>,
      %c5_68 = arith.constant 5 : index
      %c0_69 = arith.constant 0 : index
      %c0_70 = arith.constant 0 : index
      %97 = vector.load %arg5[%c5_68, %c0_69, %c0_70] : memref<6x8x128xf32, #tpu.memory_space<vmem>>, vector<1x8x128xf32>
      %98 = vector.shape_cast %97 : vector<1x8x128xf32> to vector<8x128xf32>
      %c0_71 = arith.constant 0 : index
      %c40 = arith.constant 40 : index
      %c0_72 = arith.constant 0 : index
      %99 = vector.load %arg4[%c0_71, %c40, %c0_72] : memref<1x48x128xf32, #tpu.memory_space<vmem>>, vector<1x8x128xf32>
      %100 = vector.shape_cast %99 : vector<1x8x128xf32> to vector<8x128xf32>
      %101 = vector.shape_cast %98 : vector<8x128xf32> to vector<1x8x128xf32>
      tpu.vector_store %arg4[%c0_71, %c40, %c0_72], %101 {strides = array<i32>} : memref<1x48x128xf32, #tpu.memory_space<vmem>>, vector<1x8x128xf32>,
    } else {
    }
    return
  }
  func.func @transform_0(%arg0: i32, %arg1: i32) -> (i32, i32) {
    %c1_i32 = arith.constant 1 : i32
    %0 = arith.muli %arg0, %c1_i32 : i32
    %1 = arith.addi %0, %arg1 : i32
    %c0_i32 = arith.constant 0 : i32
    %2 = arith.minsi %1, %c0_i32 : i32
    %c0_i32_0 = arith.constant 0 : i32
    %c0_i32_1 = arith.constant 0 : i32
    return %2, %c0_i32_0 : i32, i32
  }
  func.func @transform_1(%arg0: i32, %arg1: i32) -> (i32, i32) {
    %c1_i32 = arith.constant 1 : i32
    %0 = arith.muli %arg0, %c1_i32 : i32
    %1 = arith.addi %0, %arg1 : i32
    %c0_i32 = arith.constant 0 : i32
    %2 = arith.minsi %1, %c0_i32 : i32
    %c0_i32_0 = arith.constant 0 : i32
    %c0_i32_1 = arith.constant 0 : i32
    return %2, %c0_i32_0 : i32, i32
  }
  func.func @transform_2(%arg0: i32, %arg1: i32) -> (i32, i32, i32) {
    %c0_i32 = arith.constant 0 : i32
    %c0_i32_0 = arith.constant 0 : i32
    %c0_i32_1 = arith.constant 0 : i32
    return %arg0, %c0_i32, %c0_i32_0 : i32, i32, i32
  }
}

</mosaic_0001>

<bundles_post_ra>
// kernel: tpu_custom_call.1
= control target key start
LH: loop header
LB: loop body
LE: loop exit
PB: predicated region body
PF: predicated region fallthrough
CT: control target
= control target key end

     0   :  { %7 = vsyncpa [#allocation4], 0  ;;  %s283_s0 = inlined_call_operand.hbm [shape: f32[16,128], index: 0, kind: input, shape index: {}]   ;;  %s284_s1 = inlined_call_operand.hbm [shape: f32[16,128], index: 1, kind: input, shape index: {}]   ;;  %s285_s2 = inlined_call_operand.hbm [shape: f32[1,48,128], index: 2, kind: output, shape index: {}]  }
   0x1   :  { %8 = vsyncpa [#allocation7], 0 }
   0x2   :  { %9 = vsyncpa [#allocation5], 0  ;;  %s20_s11 = sshll.u32 %s283_s0, 4  ;;  %s245_s12 = smov [#allocation3]   ;;  %s21_s11 = int_to_ptr.hbm [resolvable:$true] %s20_s11 }
   0x3   :  { %s22_s13 = sshll.u32 %s245_s12, 4  ;;  %s39_s16 = sshll.u32 %s284_s1, 4  ;;  %s23_s13 = int_to_ptr.vmem [resolvable:$true] %s22_s13  ;;  %s40_s16 = int_to_ptr.hbm [resolvable:$true] %s39_s16 }
   0x4   :  { %s246_s17 = smov 128   ;;  %s247_s18 = smov 8  }
   0x5   :  { %28 = dma.hbm_to_vmem [thread:$0]  %s21_s11, 256, %s23_s13, [#allocation4], %s246_s17, %s246_s17, %s247_s18  }
   0x6   :  { %s248_s19 = smov [#allocation6]  }
   0x7   :  { %s41_s20 = sshll.u32 %s248_s19, 4  ;;  %s42_s20 = int_to_ptr.vmem [resolvable:$true] %s41_s20 }
   0x8   :  { %47 = dma.hbm_to_vmem [thread:$0]  %s40_s16, 256, %s42_s20, [#allocation7], %s246_s17, %s246_s17, %s247_s18  }
   0x9   :  { %239 = dma.done.wait [#allocation4], 256  }
   0xa   :  { %240 = vsyncadd [#allocation4], 4294967040 }
   0xb   :  { %241 = dma.done.wait [#allocation7], 256  }
   0xc   :  { %242 = vsyncadd [#allocation7], 4294967040  ;;  %v74_v0 = vld [vmem:[#allocation3] sm:$0xff]  ;;  %v75_v1 = vld [vmem:[#allocation3 + $0x8] sm:$0xff]  ;;  %s249_s0 = smov [#allocation8]   ;;  %s144_s23 = sshll.u32 %s285_s2, 4  ;;  %s145_s23 = int_to_ptr.hbm [resolvable:$true] %s144_s23 }
   0xd   :  { %v76_v2 = vld [vmem:[#allocation6] sm:$0xff]  ;;  %v77_v3 = vld [vmem:[#allocation6 + $0x8] sm:$0xff]  ;;  %v84_v5 = vadd.f32 %v75_v1, %v74_v0  ;;  %v88_v6 = vmul.f32 %v74_v0, %v74_v0  ;;  %v89_v7 = vmul.f32 %v75_v1, %v75_v1  ;;  %s142_s1 = sshll.u32 %s249_s0, 4  ;;  %s143_s1 = int_to_ptr.vmem [resolvable:$true] %s142_s1 }
   0xe   :  { %v80_v4 = vmul.f32 %v76_v2, %v74_v0  ;;  %v81_v8 = vmul.f32 %v77_v3, %v75_v1  ;;  %v86_v9 = vadd.f32 %v77_v3, %v76_v2  ;;  %v92_v10 = vmul.f32 %v76_v2, %v76_v2 }
   0xf   :  { %v93_v11 = vmul.f32 %v77_v3, %v77_v3  ;;  %129 = vst [vmem:[#allocation8 + $0x8] sm:$0xff] %v84_v5  ;;  %v90_v12 = vadd.f32 %v89_v7, %v88_v6  ;;  %v78_v13 = vsub.f32 %v74_v0, %v76_v2  ;;  %v79_v14 = vsub.f32 %v75_v1, %v77_v3 }
  0x10   :  { %v82_v15 = vadd.f32 %v81_v8, %v80_v4  ;;  %131 = vst [vmem:[#allocation8 + $0x10] sm:$0xff] %v86_v9 }
  0x11   :  { %v94_v16 = vadd.f32 %v93_v11, %v92_v10  ;;  %133 = vst [vmem:[#allocation8 + $0x18] sm:$0xff] %v90_v12  ;;  %v96_v17 = vmul.f32 %v78_v13, %v78_v13  ;;  %v97_v18 = vmul.f32 %v79_v14, %v79_v14 }
  0x12   :  { %127 = vst [vmem:[#allocation8] sm:$0xff] %v82_v15 }
  0x13   :  { %135 = vst [vmem:[#allocation8 + $0x20] sm:$0xff] %v94_v16  ;;  %v98_v19 = vadd.f32 %v97_v18, %v96_v17 }
  0x15   :  { %137 = vst [vmem:[#allocation8 + $0x28] sm:$0xff] %v98_v19 }
  0x16   :  { %150 = dma.vmem_to_hbm [thread:$0]  %s143_s1, 768, %s145_s23, [#allocation5], %s246_s17, %s246_s17, %s247_s18  }
  0x17   :  { %243 = dma.done.wait [#allocation5], 768  }
  0x18   :  { %244 = vsyncadd [#allocation5], 4294966528 }
  0x19   :  { %155 = vsyncpa [#allocation4], 1 }
  0x1a   :  { %156 = vsyncpa [#allocation7], 1 }
  0x1b   :  { %157 = vsyncpa [#allocation5], 1 }

</bundles_post_ra>
